<compile_context>
chip_gen: v7x
topology: tpu7x:2x2x1
jax: 0.10.0
libtpu: 0.0.40
codegen_flags: <defaults>
</compile_context>

<pallas_src>
import functools
import math

import jax
import jax.numpy as jnp
from jax.experimental import pallas as pl
from jax.experimental.pallas import tpu as pltpu


# ----------------------------------------------------------------------------
# Fused kernel: Bblk graphs per grid step
# ----------------------------------------------------------------------------
def _heavy_prompt_kernel(pg_ref, thr_ref, gx_ref, gadj_ref, x_ref, adj_ref):
    # pg_ref  : (Ttot, D)          prompt tokens (all groups, dgl.batch order), grid-invariant
    # thr_ref : (Ttot, total)      precomputed prune-threshold map, grid-invariant
    # gx_ref  : (Bblk, N, D)       node features for Bblk graphs
    # gadj_ref: (Bblk, N, N)       dense adjacency for Bblk graphs
    # x_ref   : (Bblk, total, D)   output features   [pg_x ; g_x]
    # adj_ref : (Bblk, total, total) output combined adjacency
    pg = pg_ref[...]
    thr = thr_ref[...]
    gx = gx_ref[...]
    gadj = gadj_ref[...]

    bblk, n, d = gx.shape
    tt = pg.shape[0]

    # --- features: [prompt tokens ; graph nodes] per graph, ONE full-block store ---
    pg_b = jnp.broadcast_to(pg[None], (bblk, tt, d))
    xcat = jnp.concatenate([pg_b, gx], axis=1)            # (Bblk, total, D)
    x_ref[...] = xcat

    # --- one batched MXU matmul: token rows vs ALL nodes (tokens + graph nodes) ---
    dot = jnp.einsum('btd,bmd->btm', pg_b, xcat,
                     preferred_element_type=jnp.float32)   # (Bblk, Ttot, total)
    sim = jax.nn.sigmoid(dot)

    # hoisted threshold map handles: inner prune on same-group token cols,
    # +inf on other-group token cols (block diagonal), cross prune on node cols.
    top = jnp.where(sim < thr[None], jnp.float32(0.0), sim)      # (Bblk, Ttot, total)

    # bottom rows: [ zeros (no node->token edges) | original graph adjacency ]
    bottom = jnp.concatenate(
        [jnp.zeros((bblk, n, tt), jnp.float32), gadj], axis=2)   # (Bblk, N, total)

    # assemble the whole (total, total) block in registers -> single full store
    adj_ref[...] = jnp.concatenate([top, bottom], axis=1)


def _pick_block_batch(batch, n, d, total):
    """Largest divisor of `batch` whose per-step payload stays ~<=4 MiB (fits the
    v5e/v6e/v7x scoped-VMEM limits with double buffering) while keeping >=2 grid
    steps so both v7x TensorCores get work."""
    per_graph_bytes = 4 * (n * d + n * n + total * d + total * total)
    cap = max(1, (4 * 1024 * 1024) // max(per_graph_bytes, 1))
    if batch >= 2:
        cap = min(cap, batch // 2)
    cap = max(1, min(cap, batch))
    bblk = 1
    for cand in range(1, cap + 1):
        if batch % cand == 0:
            bblk = cand
    return bblk


@functools.partial(jax.jit,
                   static_argnames=("inner_prune", "cross_prune", "token_per_group"))
def heavy_prompt_forward(tokens, graph_x, graph_adj, *,
                         inner_prune, cross_prune, token_per_group):
    """tokens: (G, T, D); graph_x: (B, N, D); graph_adj: (B, N, N)."""
    G, T, D = tokens.shape
    B, N, _ = graph_x.shape
    token_total = G * T
    total = token_total + N

    pg_x = tokens.reshape(token_total, D).astype(jnp.float32)   # dgl.batch of token groups
    graph_x = graph_x.astype(jnp.float32)
    graph_adj = graph_adj.astype(jnp.float32)

    # Hoisted, grid-invariant prune-threshold map (re-used from VMEM every step).
    row_group = jnp.arange(token_total, dtype=jnp.int32) // token_per_group
    col = jnp.arange(total, dtype=jnp.int32)
    is_tok_col = col < token_total
    col_group = jnp.where(is_tok_col, col // token_per_group, -1)
    same_group = row_group[:, None] == col_group[None, :]
    thr = jnp.where(is_tok_col[None, :],
                    jnp.where(same_group, jnp.float32(inner_prune), jnp.inf),
                    jnp.float32(cross_prune)).astype(jnp.float32)   # (Ttot, total)

    bblk = _pick_block_batch(B, N, D, total)
    grid = (B // bblk,)

    x_out, adj_out = pl.pallas_call(
        _heavy_prompt_kernel,
        out_shape=(
            jax.ShapeDtypeStruct((B, total, D), jnp.float32),
            jax.ShapeDtypeStruct((B, total, total), jnp.float32),
        ),
        grid=grid,
        in_specs=[
            pl.BlockSpec((token_total, D), lambda i: (0, 0)),      # prompt tokens (reused)
            pl.BlockSpec((token_total, total), lambda i: (0, 0)),  # threshold map (reused)
            pl.BlockSpec((bblk, N, D), lambda i: (i, 0, 0)),       # per-block node features
            pl.BlockSpec((bblk, N, N), lambda i: (i, 0, 0)),       # per-block adjacency
        ],
        out_specs=(
            pl.BlockSpec((bblk, total, D), lambda i: (i, 0, 0)),
            pl.BlockSpec((bblk, total, total), lambda i: (i, 0, 0)),
        ),
        compiler_params=pltpu.CompilerParams(
            dimension_semantics=("parallel",),                     # batch axis -> both TCs on v7x
            vmem_limit_bytes=32 * 1024 * 1024),
    )(pg_x, thr, graph_x, graph_adj)
    return x_out, adj_out


# ----------------------------------------------------------------------------
# HeavyPrompt (thin Python wrapper around the fused kernel)
# ----------------------------------------------------------------------------
class HeavyPromptPallas:
    def __init__(self, token_dim, token_num, group_num,
                 cross_prune=0.1, inner_prune=0.01, key=None):
        # HeavyPrompt.__init__ passes inner_prune=0.1 to LightPrompt regardless of
        # its own inner_prune argument -> replicate that.
        del inner_prune
        self.inner_prune = 0.1
        self.cross_prune = cross_prune
        self.token_dim = token_dim
        self.token_num_per_group = token_num
        self.group_num = group_num

        # kaiming_uniform_(nonlinearity='leaky_relu', a=0.01, mode='fan_in')
        a = 0.01
        gain = math.sqrt(2.0 / (1.0 + a * a))
        bound = gain * math.sqrt(3.0 / token_dim)              # fan_in = token_dim
        self.tokens = jax.random.uniform(
            key, (group_num, token_num, token_dim),
            dtype=jnp.float32, minval=-bound, maxval=bound)

    def forward(self, graph_x, graph_adj):
        """graph_x: (B, N, D); graph_adj: (B, N, N) dense adjacency.

        Returns:
          x_out  : (B, token_total + N, D)
          adj_out: (B, token_total + N, token_total + N)
        """
        return heavy_prompt_forward(
            self.tokens, graph_x, graph_adj,
            inner_prune=self.inner_prune,
            cross_prune=self.cross_prune,
            token_per_group=self.token_num_per_group)


# ----------------------------------------------------------------------------
if __name__ == "__main__":
    key = jax.random.PRNGKey(0)
    k_tok, k_x, k_adj = jax.random.split(key, 3)

    token_dim, token_num, group_num = 32, 8, 2      # token_total = 16
    B, N = 2, 16                                    # 2 graphs, 16 nodes each
    token_total = group_num * token_num
    total = token_total + N

    model = HeavyPromptPallas(token_dim, token_num, group_num,
                              cross_prune=0.1, inner_prune=0.01, key=k_tok)

    graph_x = jax.random.normal(k_x, (B, N, token_dim), dtype=jnp.float32)
    graph_adj = (jax.random.uniform(k_adj, (B, N, N)) < 0.2).astype(jnp.float32)

    x_out, adj_out = model.forward(graph_x, graph_adj)
    jax.block_until_ready((x_out, adj_out))

    # --- shape + exact structural checks (pure copies / structurally-zero regions) ---
    assert x_out.shape == (B, total, token_dim)
    assert adj_out.shape == (B, total, total)
    pg_x = model.tokens.reshape(token_total, token_dim)
    assert bool(jnp.all(x_out[:, :token_total, :] == pg_x[None]))              # prompt rows copied
    assert bool(jnp.all(x_out[:, token_total:, :] == graph_x))                 # node rows copied
    assert bool(jnp.all(adj_out[:, token_total:, token_total:] == graph_adj))  # graph block copied
    assert bool(jnp.all(adj_out[:, token_total:, :token_total] == 0.0))        # no node->token edges
    # off-diagonal group blocks of the inner prompt adjacency must be zero
    assert bool(jnp.all(adj_out[:, :token_num, token_num:token_total] == 0.0))
    assert bool(jnp.all(adj_out[:, token_num:token_total, :token_num] == 0.0))

    # --- value checks vs a pure-jnp reference (tolerant near the prune thresholds) ---
    gm = jnp.arange(token_total) // token_num
    same_group = gm[:, None] == gm[None, :]
    inner_sim = jax.nn.sigmoid(pg_x @ pg_x.T)
    inner_ref = jnp.where(same_group & ~(inner_sim < model.inner_prune), inner_sim, 0.0)
    cross_sim = jax.nn.sigmoid(jnp.einsum('td,bnd->btn', pg_x, graph_x))
    cross_ref = jnp.where(cross_sim < model.cross_prune, 0.0, cross_sim)

    top_tok = adj_out[:, :token_total, :token_total]
    top_cross = adj_out[:, :token_total, token_total:]
    ok_inner = jnp.abs(top_tok - inner_ref[None]) < 1e-4
    ok_cross = jnp.abs(top_cross - cross_ref) < 1e-4
    near_inner = jnp.abs(inner_sim - model.inner_prune)[None] < 1e-3
    near_cross = jnp.abs(cross_sim - model.cross_prune) < 1e-3
    assert bool(jnp.all(ok_inner | near_inner))
    assert bool(jnp.all(ok_cross | near_cross))

    print("KERNEL_OK")
</pallas_src>

<mosaic_0001>
module attributes {stable_mosaic.version = 11 : i64} {
  func.func @_heavy_prompt_kernel(%arg0: i32, %arg1: memref<16x32xf32, #tpu.memory_space<vmem>>, %arg2: memref<16x32xf32, #tpu.memory_space<vmem>>, %arg3: memref<1x16x32xf32, #tpu.memory_space<vmem>>, %arg4: memref<1x16x16xf32, #tpu.memory_space<vmem>>, %arg5: memref<1x32x32xf32, #tpu.memory_space<vmem>>, %arg6: memref<1x32x32xf32, #tpu.memory_space<vmem>>) attributes {dimension_semantics = [#tpu.dimension_semantics<parallel>], iteration_bounds = array<i64: 2>, scalar_prefetch = 0 : i64, scratch_operands = 0 : i64, tpu.core_type = #tpu.core_type<tc>, window_params = [{pipeline_mode = #tpu.pipeline_mode<synchronous>, transform_indices = @transform_0, window_bounds = array<i64: 16, 32>}, {pipeline_mode = #tpu.pipeline_mode<synchronous>, transform_indices = @transform_1, window_bounds = array<i64: 16, 32>}, {transform_indices = @transform_2, window_bounds = array<i64: 1, 16, 32>}, {transform_indices = @transform_3, window_bounds = array<i64: 1, 16, 16>}, {transform_indices = @transform_4, window_bounds = array<i64: 1, 32, 32>}, {transform_indices = @transform_5, window_bounds = array<i64: 1, 32, 32>}]} {
    %c0 = arith.constant 0 : index
    %c0_0 = arith.constant 0 : index
    %0 = vector.load %arg1[%c0, %c0_0] : memref<16x32xf32, #tpu.memory_space<vmem>>, vector<16x32xf32>
    %c0_1 = arith.constant 0 : index
    %c0_2 = arith.constant 0 : index
    %1 = vector.load %arg2[%c0_1, %c0_2] : memref<16x32xf32, #tpu.memory_space<vmem>>, vector<16x32xf32>
    %c0_3 = arith.constant 0 : index
    %c0_4 = arith.constant 0 : index
    %c0_5 = arith.constant 0 : index
    %2 = vector.load %arg3[%c0_3, %c0_4, %c0_5] : memref<1x16x32xf32, #tpu.memory_space<vmem>>, vector<1x16x32xf32>
    %c0_6 = arith.constant 0 : index
    %c0_7 = arith.constant 0 : index
    %c0_8 = arith.constant 0 : index
    %3 = vector.load %arg4[%c0_6, %c0_7, %c0_8] : memref<1x16x16xf32, #tpu.memory_space<vmem>>, vector<1x16x16xf32>
    %4 = vector.shape_cast %0 : vector<16x32xf32> to vector<1x16x32xf32>
    %5 = tpu.concatenate %4, %2 in 1 : vector<1x16x32xf32>, vector<1x16x32xf32> -> vector<1x32x32xf32>
    %c0_9 = arith.constant 0 : index
    %c0_10 = arith.constant 0 : index
    %c0_11 = arith.constant 0 : index
    %6 = vector.load %arg5[%c0_9, %c0_10, %c0_11] : memref<1x32x32xf32, #tpu.memory_space<vmem>>, vector<1x32x32xf32>
    tpu.vector_store %arg5[%c0_9, %c0_10, %c0_11], %5 {strides = array<i32>} : memref<1x32x32xf32, #tpu.memory_space<vmem>>, vector<1x32x32xf32>,
    "tpu.trace_start"() <{level = 10 : i32, message = "btd,bmd->btm"}> : () -> ()
    %cst = arith.constant dense<0.000000e+00> : vector<1x16x32xf32>
    %7 = tpu.matmul %4, %5, %cst {dimension_numbers = #tpu.dot_dimension_numbers<[2], [2], [1], [1], [0, 0, 0, 1, 1, 1], [0], [0]>} : vector<1x16x32xf32>, vector<1x32x32xf32>, vector<1x16x32xf32> -> vector<1x16x32xf32>
    "tpu.trace_stop"() : () -> ()
    %8 = arith.negf %7 : vector<1x16x32xf32>
    %9 = math.exp %8 : vector<1x16x32xf32>
    %cst_12 = arith.constant 1.000000e+00 : f32
    %10 = vector.broadcast %cst_12 : f32 to vector<1x16x32xf32>
    %11 = arith.addf %10, %9 : vector<1x16x32xf32>
    %12 = arith.divf %10, %11 : vector<1x16x32xf32>
    %13 = vector.shape_cast %1 : vector<16x32xf32> to vector<1x16x32xf32>
    %14 = arith.cmpf olt, %12, %13 : vector<1x16x32xf32>
    %cst_13 = arith.constant 0.000000e+00 : f32
    %15 = vector.broadcast %cst_13 : f32 to vector<1x16x32xf32>
    %16 = arith.select %14, %15, %12 : vector<1x16x32xi1>, vector<1x16x32xf32>
    %cst_14 = arith.constant 0.000000e+00 : f32
    %17 = vector.broadcast %cst_14 : f32 to vector<1x16x16xf32>
    %18 = tpu.concatenate %17, %3 in 2 : vector<1x16x16xf32>, vector<1x16x16xf32> -> vector<1x16x32xf32>
    %19 = tpu.concatenate %16, %18 in 1 : vector<1x16x32xf32>, vector<1x16x32xf32> -> vector<1x32x32xf32>
    %c0_15 = arith.constant 0 : index
    %c0_16 = arith.constant 0 : index
    %c0_17 = arith.constant 0 : index
    %20 = vector.load %arg6[%c0_15, %c0_16, %c0_17] : memref<1x32x32xf32, #tpu.memory_space<vmem>>, vector<1x32x32xf32>
    tpu.vector_store %arg6[%c0_15, %c0_16, %c0_17], %19 {strides = array<i32>} : memref<1x32x32xf32, #tpu.memory_space<vmem>>, vector<1x32x32xf32>,
    return
  }
  func.func @transform_0(%arg0: i32) -> (i32, i32) {
    %c0_i32 = arith.constant 0 : i32
    %c0_i32_0 = arith.constant 0 : i32
    %c0_i32_1 = arith.constant 0 : i32
    return %c0_i32, %c0_i32_0 : i32, i32
  }
  func.func @transform_1(%arg0: i32) -> (i32, i32) {
    %c0_i32 = arith.constant 0 : i32
    %c0_i32_0 = arith.constant 0 : i32
    %c0_i32_1 = arith.constant 0 : i32
    return %c0_i32, %c0_i32_0 : i32, i32
  }
  func.func @transform_2(%arg0: i32) -> (i32, i32, i32) {
    %c0_i32 = arith.constant 0 : i32
    %c0_i32_0 = arith.constant 0 : i32
    %c0_i32_1 = arith.constant 0 : i32
    return %arg0, %c0_i32, %c0_i32_0 : i32, i32, i32
  }
  func.func @transform_3(%arg0: i32) -> (i32, i32, i32) {
    %c0_i32 = arith.constant 0 : i32
    %c0_i32_0 = arith.constant 0 : i32
    %c0_i32_1 = arith.constant 0 : i32
    return %arg0, %c0_i32, %c0_i32_0 : i32, i32, i32
  }
  func.func @transform_4(%arg0: i32) -> (i32, i32, i32) {
    %c0_i32 = arith.constant 0 : i32
    %c0_i32_0 = arith.constant 0 : i32
    %c0_i32_1 = arith.constant 0 : i32
    return %arg0, %c0_i32, %c0_i32_0 : i32, i32, i32
  }
  func.func @transform_5(%arg0: i32) -> (i32, i32, i32) {
    %c0_i32 = arith.constant 0 : i32
    %c0_i32_0 = arith.constant 0 : i32
    %c0_i32_1 = arith.constant 0 : i32
    return %arg0, %c0_i32, %c0_i32_0 : i32, i32, i32
  }
}

</mosaic_0001>

<bundles_post_ra>
// kernel: heavy_prompt_forward.1
= control target key start
LH: loop header
LB: loop body
LE: loop exit
PB: predicated region body
PF: predicated region fallthrough
CT: control target
= control target key end

     0   :  { %11 = vsyncpa [#allocation3], 0  ;;  %s1218_s0 = inlined_call_operand.hbm [shape: f32[16,32], index: 0, kind: input, shape index: {}]   ;;  %s1219_s1 = inlined_call_operand.vmem [shape: f32[16,32], index: 1, kind: input, shape index: {}]   ;;  %s1220_s2 = inlined_call_operand.vmem [shape: f32[2,16,32], index: 2, kind: input, shape index: {}]   ;;  %s1221_s3 = inlined_call_operand.hbm [shape: f32[2,16,16], index: 3, kind: input, shape index: {}]   ;;  %s1222_s4 = inlined_call_operand.hbm [shape: f32[2,32,32], index: 4, kind: output, shape index: {0}]   ;;  %s1223_s5 = inlined_call_operand.hbm [shape: f32[2,32,32], index: 5, kind: output, shape index: {1}]  }
   0x1   :  { %12 = vsyncpa [#allocation6], 0 }
   0x2   :  { %14 = vsyncpa [#allocation6 + $0x1], 0 }
   0x3   :  { %15 = vsyncpa [#allocation4], 0 }
   0x4   :  { %17 = vsyncpa [#allocation4 + $0x1], 0 }
   0x5   :  { %18 = vsyncpa [#allocation9], 0 }
   0x6   :  { %20 = vsyncpa [#allocation9 + $0x1], 0  ;;  %s923_s18 = smov 0   ;;  %s925_s19 = smov 0  }
   0x7   :  { %s927_s20 = smov 0   ;;  %s929_s21 = smov 0  }
   0x8 LB: > { %s944_s22 = sadd.s32 4294967295, %s882_s21   ;;  %s584_s23 = sadd.s32 4294967294, %s882_s21   ;;  %s882_s21 = sphi %s929_s21, %s1245_s21   ;;  %s878_s20 = sphi %s927_s20, %s1244_s20   ;;  %s874_s19 = sphi %s925_s19, %s1243_s19   ;;  %s870_s18 = sphi %s923_s18, %s1242_s18  }
   0x9   : > { %p114_p0 = scmp.ne.s32.totalorder %s874_s19, %s870_s18  ;;  %p1224_p1 = scmp.eq.s32.totalorder %s944_s22, 0 }
   0xa   : > { %p144_p3 = scmp.eq.s32.totalorder %s584_s23, 1  ;;  %p585_p5 = scmp.ge.s32.totalorder %s882_s21, 1 }
   0xb   : > { %p953_p4 = por %p1224_p1, %p114_p0  ;;  %p177_p7 = scmp.lt.s32.totalorder %s882_s21, 3 }
   0xc   : > { %p958_p6 = por %p144_p3, %p114_p0  ;;  %s884_s27 = smov [#allocation2]  }
   0xd   : > { %s1227_s24 = scalar_select %p953_p4, 1, 0 }
   0xe   : > { %s1228_s25 = scalar_select %p958_p6, 1, 0 }
   0xf   : > { %p963_p8 = pnand %p585_p5, %p177_p7  ;;  %s189_s28 = sshll.u32 %s884_s27, 4  ;;  %s967_s28 = int_to_ptr.vmem [resolvable:$true] %s189_s28 }
  0x10   : > { %s979_s30 = sadd.s32 1, %s882_s21   ;;  %s101_s6 = sadd.s32 1, %s878_s20 }
  0x11   : > { %s1229_s26 = scalar_select %p963_p8, 1, 0 }
  0x12   : > { %p657_p9 = pneg %p963_p8  ;;  %s98_s7 = ssub.s32 %s882_s21, %s979_s30 }
  0x13   : > { %s722_s10 = scalar_lea.hbm %s1218_s0, 256 }
  0x14   : > { %p974_p11 = pnand %p657_p9, %p1224_p1  ;;  %p723_p12 = scmp.ne.s32.totalorder %s1218_s0, %s722_s10 }
  0x15   : > { %p729_p5 = scmp.lt.u32.totalorder %s722_s10, %s1218_s0 }
  0x16   : > { %p724_p13 = pneg %p974_p11 }
  0x18   : > { %p725_p0 = pnand %p724_p13, %p723_p12 }
  0x1a   : > { %p726_p3 = pneg %p725_p0 }
  0x1c   : > { %p731_p7 = pnand %p729_p5, %p726_p3 }
  0x1e   : > { %734 = shalt.err (!%p731_p7)
}
  0x1f   : > { %s735_s15 = scalar_lea.vmem %s967_s28, 256  ;;  %p743_p2 = scmp.lt.s32.totalorder %s967_s28, %s967_s28 }
  0x20   : > { %p736_p9 = scmp.ne.s32.totalorder %s967_s28, %s735_s15  ;;  %p744_p6 = scmp.lt.s32.totalorder %s735_s15, %s735_s15 }
  0x22   : > { %p738_p10 = pnand %p736_p9, %p724_p13  ;;  %p745_p4 = por %p744_p6, %p743_p2 }
  0x24   : > { %p739_p1 = pneg %p738_p10 }
  0x26   : > { %p746_p8 = pnand %p745_p4, %p739_p1 }
  0x28   : > { %749 = shalt.err (!%p746_p8)
}
  0x29   : > { %s885_s16 = smov 128   ;;  %s886_s17 = smov 8  }
  0x2a   : > { %660 = dma.hbm_to_vmem [thread:$0]  (!%p974_p11), %s1218_s0, 256, %s967_s28, [#allocation3], %s885_s16, %s885_s16, %s886_s17  }
  0x2b   : > { %p99_p1 = scmp.eq.s32.totalorder %s98_s7, 0  ;;  %p108_p2 = scmp.ne.s32.totalorder %s878_s20, %s874_s19 }
  0x2c   : > { %p109_p4 = scmp.eq.s32.totalorder %s882_s21, 0  ;;  %p673_p6 = scmp.lt.s32.totalorder %s882_s21, 2 }
  0x2d   : > { %s1013_s8 = scalar_select %p99_p1, %s878_s20, %s101_s6  }
  0x2e   : > { %p110_p8 = por %p109_p4, %p108_p2  ;;  %p1231_p10 = scmp.eq.s32.totalorder %s944_s22, 1 }
  0x2f   : > { %s214_s29 = sand.u32 1, %s878_s20   ;;  %s614_s10 = sshll.u32 %s882_s21, 8 }
  0x30   : > { %p1017_p12 = por %p1231_p10, %p108_p2  ;;  %s588_s11 = sshll.u32 %s214_s29, 4 }
  0x31   : > { %s1026_s14 = scalar_lea.hbm %s1221_s3, %s614_s10  ;;  %s218_s28 = scalar_lea.vmem [#allocation5], %s588_s11 }
  0x32   : > { %s225_s6 = sshll.u32 %s218_s28, 4  ;;  %p1028_p11 = pnand %p673_p6, %p110_p8  ;;  %s1032_s6 = int_to_ptr.vmem [resolvable:$true] %s225_s6 }
  0x33   : > { %s1034_s15 = scalar_lea.sflag [#allocation6], %s214_s29  ;;  %s750_s23 = scalar_lea.hbm %s1026_s14, 256 }
  0x34   : > { %p751_p13 = scmp.ne.s32.totalorder %s1026_s14, %s750_s23  ;;  %p752_p0 = pneg %p1028_p11 }
  0x35   : > { %s755_s11 = scalar_lea.hbm %s1221_s3, 512  ;;  %p756_p7 = scmp.lt.u32.totalorder %s1026_s14, %s1221_s3 }
  0x36   : > { %p753_p3 = pnand %p752_p0, %p751_p13  ;;  %p757_p9 = scmp.lt.u32.totalorder %s755_s11, %s750_s23 }
  0x37   : > { %p759_p2 = scmp.lt.u32.totalorder %s750_s23, %s1026_s14 }
  0x38   : > { %p754_p5 = pneg %p753_p3  ;;  %p758_p1 = por %p757_p9, %p756_p7 }
  0x3a   : > { %p760_p4 = por %p759_p2, %p758_p1 }
  0x3c   : > { %p761_p6 = pnand %p760_p4, %p754_p5 }
  0x3e   : > { %764 = shalt.err (!%p761_p6)
}
  0x3f   : > { %s765_s29 = scalar_lea.vmem %s1032_s6, 256  ;;  %s887_s28 = smov [#allocation5]  }
  0x40   : > { %p766_p8 = scmp.ne.s32.totalorder %s1032_s6, %s765_s29  ;;  %s770_s27 = sshll.u32 %s887_s28, 4  ;;  %s771_s27 = int_to_ptr.vmem [resolvable:$false] %s770_s27 }
  0x41   : > { %s772_s10 = scalar_lea.vmem %s771_s27, 512  ;;  %p773_p3 = scmp.lt.s32.totalorder %s1032_s6, %s771_s27 }
  0x42   : > { %p768_p10 = pnand %p766_p8, %p752_p0  ;;  %p774_p7 = scmp.lt.s32.totalorder %s772_s10, %s765_s29 }
  0x44   : > { %p769_p13 = pneg %p768_p10  ;;  %p775_p9 = por %p774_p7, %p773_p3 }
  0x46   : > { %p776_p1 = pnand %p775_p9, %p769_p13 }
  0x48   : > { %779 = shalt.err (!%p776_p1)
}
  0x49   : > { %664 = dma.hbm_to_vmem [thread:$0]  (!%p1028_p11), %s1026_s14, 256, %s1032_s6, %s1034_s15, %s885_s16, %s885_s16, %s886_s17  }
  0x4a   : > { %p1234_p0 = scmp.ne.s32.totalorder %s1229_s26, 0 }
  0x4b   : > { %p1235_p5 = scmp.eq.s32.totalorder (!%p1234_p0), %s944_s22, 0 }
  0x4c   : > { %237 = sbr.rel (%p1234_p0) target bundleno = 362 (0x16a), region = 36 }
  0x53   : > { %853 = dma.done.wait (%p1235_p5), [#allocation3], 256   ;;  %p1236_p2 = pmov %p1235_p5 }
  0x54   : > { %s1072_s23 = sand.u32 1, %s874_s19   ;;  %p1237_p4 = scmp.ne.s32.totalorder %s1227_s24, 0 }
  0x55   : > { %855 = vsyncadd (%p1236_p2), [#allocation3], 4294967040  ;;  %s593_s7 = sshll.u32 %s1072_s23, 4  ;;  %s244_s11 = scalar_lea.sflag [#allocation6], %s1072_s23 }
  0x56   : > { %s247_s12 = scalar_lea.vmem [#allocation5], %s593_s7 }
  0x57   : > { %857 = dma.done.wait (%p1237_p4), %s244_s11, 256  }
  0x58   : > { %859 = vsyncadd (%p1237_p4), %s244_s11, 4294967040  ;;  %p284_p11 = scmp.lt.s32.totalorder %s944_s22, 1  ;;  %s594_s26 = sshll.u32 %s1072_s23, 5  ;;  %vm297_vm0 = vcmask 261120   ;;  %v289_v1 = vld [vmem:[#allocation2] sm:$0xff]  ;;  %v290_v2 = vld [vmem:[#allocation2 + $0x8] sm:$0xff] }
  0x59   : > { %vm1085_vm1 = vmpackc.low %vm297_vm0, %vm297_vm0  ;;  %v295_v3 = vld [vmem:[%s247_s12] sm:$0xff]  ;;  %s276_s15 = scalar_lea.vmem [#allocation7], %s594_s26  ;;  %v635_v4 = vpack.c.bf16 %v290_v2, %v289_v1  ;;  %632 = vmatprep.mubr.msk.f32.mxu0 %vm297_vm0, %v289_v1  ;;  %s888_s13 = smov 16   ;;  %v296_v8 = vld [vmem:[%s247_s12 + $0x8] sm:$0xff]  ;;  %vm413_vm2 = vcmask 130048  }
  0x5a   : > { %s285_s16 = scalar_select %p284_p11, %s944_s22, 1  ;;  %298 = vst.msk [vmem:[%s276_s15] sm:$0xff] %vm297_vm0, %v289_v1  ;;  %299 = vst.msk [vmem:[%s276_s15 + $0x8] sm:$0xff] %vm297_vm0, %v290_v2  ;;  %407 = vrot.lane.b32.xlu0 %v295_v3, %s888_s13 }
  0x5b   : > { %637 = vmatprep.subr.msk.bf16.mxu0 %vm1085_vm1, %v635_v4  ;;  %s1110_s29 = scalar_lea.vmem [#allocation8], %s594_s26  ;;  %s439_s28 = sshll.u32 %s276_s15, 4  ;;  %s1115_s28 = int_to_ptr.vmem [resolvable:$true] %s439_s28 }
  0x5c   : > { %s615_s17 = sshll.u32 %s285_s16, 4  ;;  %640 = vmatpush3.bf16.xpose.msk.msra.mxu0 %vm1085_vm1, %v635_v4  ;;  %s616_s27 = sshll.u32 %s944_s22, 9 }
  0x5d   : > { %s288_s6 = scalar_lea.vmem %s1220_s2, %s615_s17  ;;  %s1124_s11 = scalar_lea.hbm %s1222_s4, %s616_s27 }
  0x5e   : > { %v293_v5 = vld [vmem:[%s288_s6] sm:$0xff]  ;;  %v294_v6 = vld [vmem:[%s288_s6 + $0x8] sm:$0xff]  ;;  %409 = vrot.lane.b32.xlu0 %v296_v8, %s888_s13  ;;  %s421_s12 = scalar_lea.sflag [#allocation4], %s1072_s23  ;;  %s780_s26 = scalar_lea.vmem %s1115_s28, 512 }
  0x5f   : > { %300 = vst.msk [vmem:[%s276_s15 + $0x10] sm:$0xff] %vm297_vm0, %v293_v5  ;;  %301 = vst.msk [vmem:[%s276_s15 + $0x18] sm:$0xff] %vm297_vm0, %v294_v6  ;;  %v641_v7 = vpack.c.bf16 %v294_v6, %v293_v5  ;;  %p781_p6 = scmp.ne.s32.totalorder %s1115_s28, %s780_s26  ;;  %s889_s16 = smov [#allocation7]  }
  0x60   : > { %s784_s17 = sshll.u32 %s889_s16, 4  ;;  %s785_s17 = int_to_ptr.vmem [resolvable:$false] %s784_s17 }
  0x61   : > { %643 = vmatprep.subr.msk.bf16.mxu0 %vm1085_vm1, %v641_v7  ;;  %p782_p8 = pnand %p781_p6, %p1017_p12  ;;  %s786_s14 = scalar_lea.vmem %s785_s17, 1024 }
  0x62   : > { %p787_p13 = scmp.lt.s32.totalorder %s1115_s28, %s785_s17  ;;  %p788_p3 = scmp.lt.s32.totalorder %s786_s14, %s780_s26 }
  0x63   : > { %p783_p10 = pneg %p782_p8 }
  0x64   : > { %646 = vmatpush3.bf16.xpose.msk.msra.mxu0 %vm1085_vm1, %v641_v7  ;;  %p789_p7 = por %p788_p3, %p787_p13 }
  0x66   : > { %p790_p9 = pnand %p789_p7, %p783_p10 }
  0x6b   : > { %633 = vmatmul.mubr.msk.f32.vlgmr.msra.gmra.mrb[0].mxu0 %vm297_vm0, %v290_v2 }
  0xcc   : > { %v408_v9 = vpop.permute.xlu0 %407 }
  0xcd   : > { %v414_v10 = vsel %vm413_vm2, 0.0, %v408_v9 }
  0xce   : > { %418 = vst.msk [vmem:[%s1110_s29 + $0x10] sm:$0xff] %vm297_vm0, %v414_v10 }
  0xd0   : > { %v410_v11 = vpop.permute.xlu0 %409 }
  0xd1   : > { %v415_v12 = vsel %vm413_vm2, 0.0, %v410_v11 }
  0xd2   : > { %419 = vst.msk [vmem:[%s1110_s29 + $0x18] sm:$0xff] %vm297_vm0, %v415_v12 }
  0xd3   : > { %793 = shalt.err (!%p790_p9)
}
  0xd4   : > { %s794_s24 = scalar_lea.hbm %s1124_s11, 512  ;;  %s798_s13 = scalar_lea.hbm %s1222_s4, 1024 }
  0xd5   : > { %p795_p1 = scmp.ne.s32.totalorder %s1124_s11, %s794_s24  ;;  %p799_p2 = scmp.lt.u32.totalorder %s1124_s11, %s1222_s4 }
  0xd6   : > { %p800_p4 = scmp.lt.u32.totalorder %s798_s13, %s794_s24  ;;  %p802_p6 = scmp.lt.u32.totalorder %s794_s24, %s1124_s11 }
  0xd7   : > { %p796_p0 = pnand %p795_p1, %p1017_p12 }
  0xd8   : > { %p801_p11 = por %p800_p4, %p799_p2 }
  0xd9   : > { %p797_p5 = pneg %p796_p0 }
  0xda   : > { %p803_p8 = por %p802_p6, %p801_p11 }
  0xdc   : > { %p804_p10 = pnand %p803_p8, %p797_p5 }
  0xde   : > { %807 = shalt.err (!%p804_p10)
}
  0xdf   : > { %s890_s26 = smov 128   ;;  %s891_s16 = smov 8   ;;  %v292_v21 = vld [vmem:[%s1219_s1 + $0x8] sm:$0xff]  ;;  %v291_v22 = vld [vmem:[%s1219_s1] sm:$0xff] }
  0xe0   : > { %653 = dma.vmem_to_hbm [thread:$0]  (%p1017_p12), %s1115_s28, 512, %s1124_s11, %s421_s12, %s890_s26, %s890_s26, %s891_s16  }
  0xe1   : > { %s455_s28 = sshll.u32 %s1110_s29, 4  ;;  %s1167_s15 = scalar_lea.hbm %s1223_s5, %s616_s27  ;;  %s1160_s28 = int_to_ptr.vmem [resolvable:$true] %s455_s28 }
  0xe2   : > { %s426_s13 = scalar_lea.sflag [#allocation9], %s1072_s23  ;;  %s808_s10 = scalar_lea.vmem %s1160_s28, 512 }
  0xe3   : > { %p809_p13 = scmp.ne.s32.totalorder %s1160_s28, %s808_s10  ;;  %s892_s7 = smov [#allocation8]  }
  0xe4   : > { %s812_s17 = sshll.u32 %s892_s7, 4  ;;  %s813_s17 = int_to_ptr.vmem [resolvable:$false] %s812_s17 }
  0xe5   : > { %p810_p3 = pnand %p809_p13, %p1017_p12  ;;  %s814_s22 = scalar_lea.vmem %s813_s17, 1024 }
  0xe6   : > { %p815_p9 = scmp.lt.s32.totalorder %s1160_s28, %s813_s17  ;;  %p816_p1 = scmp.lt.s32.totalorder %s814_s22, %s808_s10 }
  0xe7   : > { %p811_p7 = pneg %p810_p3 }
  0xe8   : > { %p817_p0 = por %p816_p1, %p815_p9 }
  0xea   : > { %p818_p5 = pnand %p817_p0, %p811_p7 }
 0x13e   : > { %v634_v13 = vpop.f32.mrb[0].mxu0 }
 0x13f   : > { %v605_v14 = vmul.f32 -1.442695, %v634_v13  ;;  %v380_v15 = vpop.f32.mrb[1].mxu0 }
 0x140   : > { %v604_v16 = vmul.f32 -1.442695, %v380_v15 }
 0x141   : > { %714 = vpow2.f32 %v605_v14 }
 0x142   : > { %716 = vpow2.f32 %v604_v16 }
 0x14b   : > { %v715_v17 = vpop.eup %714 }
 0x14c   : > { %v717_v18 = vpop.eup %716  ;;  %v396_v19 = vadd.f32 1.0, %v715_v17 }
 0x14d   : > { %v395_v20 = vadd.f32 1.0, %v717_v18 }
 0x14e   : > { %718 = vrcp.f32 %v396_v19 }
 0x14f   : > { %720 = vrcp.f32 %v395_v20 }
 0x158   : > { %v719_v23 = vpop.eup %718 }
 0x159   : > { %v721_v24 = vpop.eup %720  ;;  %vm402_vm3 = vcmp.lt.f32.partialorder %v719_v23, %v292_v21 }
 0x15a   : > { %v404_v25 = vsel %vm402_vm3, 0.0, %v719_v23  ;;  %vm401_vm4 = vcmp.lt.f32.partialorder %v721_v24, %v291_v22 }
 0x15b   : > { %v403_v26 = vsel %vm401_vm4, 0.0, %v721_v24  ;;  %417 = vst.msk [vmem:[%s1110_s29 + $0x8] sm:$0xff] %vm297_vm0, %v404_v25 }
 0x15c   : > { %416 = vst.msk [vmem:[%s1110_s29] sm:$0xff] %vm297_vm0, %v403_v26 }
 0x15d   : > { %821 = shalt.err (!%p818_p5)
}
 0x15e   : > { %s822_s29 = scalar_lea.hbm %s1167_s15, 512  ;;  %s826_s11 = scalar_lea.hbm %s1223_s5, 1024 }
 0x15f   : > { %p823_p2 = scmp.ne.s32.totalorder %s1167_s15, %s822_s29  ;;  %p827_p6 = scmp.lt.u32.totalorder %s1167_s15, %s1223_s5 }
 0x160   : > { %p828_p8 = scmp.lt.u32.totalorder %s826_s11, %s822_s29  ;;  %p830_p13 = scmp.lt.u32.totalorder %s822_s29, %s1167_s15 }
 0x161   : > { %p824_p4 = pnand %p823_p2, %p1017_p12 }
 0x162   : > { %p829_p10 = por %p828_p8, %p827_p6 }
 0x163   : > { %p825_p11 = pneg %p824_p4 }
 0x164   : > { %p831_p3 = por %p830_p13, %p829_p10 }
 0x166   : > { %p832_p7 = pnand %p831_p3, %p825_p11 }
 0x168   : > { %835 = shalt.err (!%p832_p7)
}
 0x169   : > { %654 = dma.vmem_to_hbm [thread:$0]  (%p1017_p12), %s1160_s28, 512, %s1167_s15, %s426_s13, %s890_s26, %s890_s26, %s891_s16  }
 0x16a PF: > { %s470_s6 = sand.u32 1, %s870_s18   ;;  %p1240_p9 = scmp.ne.s32.totalorder %s1228_s25, 0 }
 0x16b   : > { %p1241_p1 = scmp.ge.s32.totalorder %s882_s21, 2  ;;  %s471_s10 = scalar_lea.sflag [#allocation4], %s470_s6 }
 0x16d   : > { %p666_p0 = pnand %p1241_p1, %p1240_p9 }
 0x16f   : > { %861 = dma.done.wait (!%p666_p0), %s471_s10, 512  }
 0x170   : > { %863 = vsyncadd (!%p666_p0), %s471_s10, 4294966784  ;;  %s480_s9 = scalar_lea.sflag [#allocation9], %s470_s6 }
 0x171   : > { %865 = dma.done.wait (!%p666_p0), %s480_s9, 512  }
 0x172   : > { %867 = vsyncadd (!%p666_p0), %s480_s9, 4294966784  ;;  %p23_p12 = scmp.ge.s32.totalorder %s979_s30, 4   ;;  %s1242_s18 = smov %s874_s19 }
 0x173   : > { %s1243_s19 = smov %s878_s20  ;;  %s1244_s20 = smov %s1013_s8 }
 0x174   : > { %s1245_s21 = smov %s979_s30  ;;  %25 = sbr.rel (!%p23_p12) target bundleno = 8 (0x8), region = 106 }
 0x17b   :  { %485 = vsyncpa [#allocation3], 1 }
 0x17c   :  { %487 = vsyncpa [#allocation3 + $0x1], 1 }
 0x17d   :  { %488 = vsyncpa [#allocation6], 1 }
 0x17e   :  { %490 = vsyncpa [#allocation6 + $0x1], 1 }
 0x17f   :  { %491 = vsyncpa [#allocation4], 1 }
 0x180   :  { %493 = vsyncpa [#allocation4 + $0x1], 1 }
 0x181   :  { %494 = vsyncpa [#allocation9], 1 }
 0x182   :  { %496 = vsyncpa [#allocation9 + $0x1], 1 }

</bundles_post_ra>
